<compile_context>
chip_gen: v5e
topology: v5e:2x2
jax: 0.10.0
libtpu: 0.0.40
codegen_flags: <defaults>
</compile_context>

<pallas_src>
import jax
import jax.numpy as jnp
from jax.experimental import pallas as pl
from jax.experimental.pallas import tpu as pltpu


def _normalize_kernel(x_ref, p_ref, o_ref):
    # x_ref / o_ref : (TILE_R, TILE_L) tile of the flattened (N*C, H*W) array
    # p_ref         : (TILE_R, 2) f32 per-row constants: [:,0]=scale, [:,1]=bias
    x = x_ref[...].astype(jnp.float32)
    scale = p_ref[:, 0:1]            # (TILE_R, 1) broadcasts across lanes
    bias = p_ref[:, 1:2]
    o_ref[...] = (x * scale + bias).astype(o_ref.dtype)


def _target_tile_bytes():
    """Per-buffer *padded* VMEM budget; conservative default, bigger on v7x."""
    target = 2 * 1024 * 1024         # safe everywhere: ~8 MiB live w/ dbl-buffering
    try:
        vmem = pltpu.get_tpu_info().vmem_capacity_bytes
        # v7x-class parts report <= 64 MiB VMEM per TC but have ~3.2 TB/s HBM:
        # larger tiles amortize the fixed per-grid-step overhead. ~16 MiB live,
        # still under the 32 MiB default scoped limit -> no vmem_limit needed.
        if vmem is not None and int(vmem) <= 64 * 1024 * 1024:
            target = 4 * 1024 * 1024
    except Exception:
        pass
    return target


def _choose_tiles(R, L, itemsize, target_bytes):
    """Pick (tile_r, tile_l) obeying the (8,128)/full-dim rule.

    The budget is applied to the lane/sublane *padded* tile bytes, which is
    what actually occupies VMEM.
    """
    sub = {4: 8, 2: 16, 1: 32}.get(itemsize, 8)   # sublane multiple per dtype
    LANE = 128

    def pad_up(v, m):
        return -(-v // m) * m

    l_pad = pad_up(L, LANE)

    if sub * l_pad * itemsize <= target_bytes:
        # Full lane extent per block; grow the row tile within the padded budget.
        tile_l = L
        max_rows = target_bytes // (l_pad * itemsize)
        if max_rows >= R:
            tile_r = R                               # full dim (always legal)
        else:
            tile_r = max(sub, (max_rows // sub) * sub)
    else:
        # Rows are huge even sub-deep: keep a minimal row tile, tile lanes.
        tile_r = R if R <= sub else sub
        max_lanes = target_bytes // (pad_up(tile_r, sub) * itemsize)
        if max_lanes >= L:
            tile_l = L
        else:
            tile_l = max(LANE, (max_lanes // LANE) * LANE)

    # Guarantee >= 2 grid steps along a "parallel" axis for arrays worth
    # splitting, so v7x's 2 TensorCores both get work (no cost on v5e/v6e).
    total_padded = pad_up(R, sub) * l_pad * itemsize
    if total_padded > (1 << 20) and pl.cdiv(R, tile_r) * pl.cdiv(L, tile_l) < 2:
        if R >= 2 * sub:
            tile_r = max(sub, ((R // 2) // sub) * sub)
        elif L >= 2 * LANE:
            tile_l = max(LANE, ((L // 2) // LANE) * LANE)

    return tile_r, tile_l


def normalize(x, mean=None, std=None, *, donate_x=False):
    """Pallas equivalent of Normalize.forward. Identity if mean/std is None."""
    if mean is None or std is None:
        return x  # matches PyTorch: forward returns x unchanged

    N, C, H, W = x.shape
    R, L = N * C, H * W

    # Flatten to a lane-dense 2-D problem (contiguous reshape: no data movement).
    x2 = x.reshape(R, L)

    # Fold mean/std into scale = 1/std, bias = -mean/std; single (R, 2) operand.
    mean_f = jnp.asarray(mean, dtype=jnp.float32).reshape(C)
    std_f = jnp.asarray(std, dtype=jnp.float32).reshape(C)
    scale_c = 1.0 / std_f
    bias_c = -mean_f * scale_c
    # row r = n*C + c  ->  channel c
    params = jnp.tile(jnp.stack([scale_c, bias_c], axis=-1), (N, 1))   # (R, 2)

    tile_r, tile_l = _choose_tiles(R, L, x.dtype.itemsize, _target_tile_bytes())
    # Lane axis (j) is the innermost grid axis: the params block index is
    # constant over j, so params are only re-fetched when the row tile changes.
    grid = (pl.cdiv(R, tile_r), pl.cdiv(L, tile_l))

    extra = {}
    if donate_x:
        # Caller-donated input: alias x2 -> out2 (halves peak HBM footprint).
        extra["input_output_aliases"] = {0: 0}

    out2 = pl.pallas_call(
        _normalize_kernel,
        out_shape=jax.ShapeDtypeStruct((R, L), x.dtype),
        grid_spec=pltpu.PrefetchScalarGridSpec(
            num_scalar_prefetch=0,
            grid=grid,
            in_specs=[
                pl.BlockSpec((tile_r, tile_l), lambda i, j: (i, j)),
                pl.BlockSpec((tile_r, 2), lambda i, j: (i, 0)),
            ],
            out_specs=pl.BlockSpec((tile_r, tile_l), lambda i, j: (i, j)),
        ),
        compiler_params=pltpu.CompilerParams(
            dimension_semantics=("parallel", "parallel")),
        **extra,
    )(x2, params)

    return out2.reshape(N, C, H, W)


if __name__ == "__main__":
    key = jax.random.PRNGKey(0)
    N, C, H, W = 2, 4, 16, 16
    x = jax.random.normal(key, (N, C, H, W), dtype=jnp.float32)

    # deterministic per-channel normalization constants (synthetic)
    mean = [0.1, 0.2, 0.3, 0.4]
    std = [0.5, 0.6, 0.7, 0.8]

    out = normalize(x, mean, std)
    out = jax.block_until_ready(out)

    # reference check in plain JAX (same broadcasting as the PyTorch module)
    mean_b = jnp.asarray(mean, jnp.float32)[None, :, None, None]
    std_b = jnp.asarray(std, jnp.float32)[None, :, None, None]
    ref = (x - mean_b) / std_b
    assert out.shape == x.shape and out.dtype == x.dtype
    # x*(1/s) - m*(1/s) vs (x - m)/s differ only at the ULP level -> 1e-5 tol
    assert jnp.allclose(out, ref, atol=1e-5, rtol=1e-5)

    # mean=None path: identity
    ident = normalize(x)
    assert ident is x

    print("KERNEL_OK")
</pallas_src>

<mosaic_0001>
module attributes {stable_mosaic.version = 11 : i64} {
  func.func @_normalize_kernel(%arg0: i32, %arg1: i32, %arg2: memref<8x256xf32, #tpu.memory_space<vmem>>, %arg3: memref<8x2xf32, #tpu.memory_space<vmem>>, %arg4: memref<8x256xf32, #tpu.memory_space<vmem>>) attributes {dimension_semantics = [#tpu.dimension_semantics<parallel>, #tpu.dimension_semantics<parallel>], iteration_bounds = array<i64: 1, 1>, scalar_prefetch = 0 : i64, scratch_operands = 0 : i64, tpu.core_type = #tpu.core_type<tc>, window_params = [{transform_indices = @transform_0, window_bounds = array<i64: 8, 256>}, {transform_indices = @transform_1, window_bounds = array<i64: 8, 2>}, {transform_indices = @transform_2, window_bounds = array<i64: 8, 256>}]} {
    %c0 = arith.constant 0 : index
    %c0_0 = arith.constant 0 : index
    %0 = vector.load %arg2[%c0, %c0_0] : memref<8x256xf32, #tpu.memory_space<vmem>>, vector<8x256xf32>
    %c0_1 = arith.constant 0 : index
    %c0_2 = arith.constant 0 : index
    %1 = vector.load %arg3[%c0_1, %c0_2] : memref<8x2xf32, #tpu.memory_space<vmem>>, vector<8x1xf32>
    %c0_3 = arith.constant 0 : index
    %c1 = arith.constant 1 : index
    %2 = vector.load %arg3[%c0_3, %c1] : memref<8x2xf32, #tpu.memory_space<vmem>>, vector<8x1xf32>
    %3 = vector.broadcast %1 : vector<8x1xf32> to vector<8x256xf32>
    %4 = arith.mulf %0, %3 : vector<8x256xf32>
    %5 = vector.broadcast %2 : vector<8x1xf32> to vector<8x256xf32>
    %6 = arith.addf %4, %5 : vector<8x256xf32>
    %c0_4 = arith.constant 0 : index
    %c0_5 = arith.constant 0 : index
    %7 = vector.load %arg4[%c0_4, %c0_5] : memref<8x256xf32, #tpu.memory_space<vmem>>, vector<8x256xf32>
    tpu.vector_store %arg4[%c0_4, %c0_5], %6 {strides = array<i32>} : memref<8x256xf32, #tpu.memory_space<vmem>>, vector<8x256xf32>,
    return
  }
  func.func @transform_0(%arg0: i32, %arg1: i32) -> (i32, i32) {
    %c0_i32 = arith.constant 0 : i32
    return %arg0, %arg1 : i32, i32
  }
  func.func @transform_1(%arg0: i32, %arg1: i32) -> (i32, i32) {
    %c0_i32 = arith.constant 0 : i32
    %c0_i32_0 = arith.constant 0 : i32
    return %arg0, %c0_i32 : i32, i32
  }
  func.func @transform_2(%arg0: i32, %arg1: i32) -> (i32, i32) {
    %c0_i32 = arith.constant 0 : i32
    return %arg0, %arg1 : i32, i32
  }
}

</mosaic_0001>

<bundles_post_ra>
// kernel: tpu_custom_call.1
= control target key start
LH: loop header
LB: loop body
LE: loop exit
PB: predicated region body
PF: predicated region fallthrough
CT: control target
= control target key end

     0   :  { %7 = vsyncpa [#allocation3], 0  ;;  %s147_s0 = inlined_call_operand.hbm [shape: f32[8,256], index: 0, kind: input, shape index: {}]   ;;  %s148_s1 = inlined_call_operand.vmem [shape: f32[8,2], index: 1, kind: input, shape index: {}]   ;;  %s149_s2 = inlined_call_operand.hbm [shape: f32[8,256], index: 2, kind: output, shape index: {}]  }
   0x1   :  { %8 = vsyncpa [#allocation4], 0  ;;  %s14_s11 = sshll.u32 %s147_s0, 4  ;;  %s119_s12 = smov [#allocation2]   ;;  %s15_s11 = int_to_ptr.hbm [resolvable:$true] %s14_s11 }
   0x2   :  { %s16_s13 = sshll.u32 %s119_s12, 4  ;;  %s17_s13 = int_to_ptr.vmem [resolvable:$true] %s16_s13 }
   0x3   :  { %19 = dma.hbm_to_vmem [thread:$0]  %s15_s11, 256, %s17_s13, [#allocation3]  }
   0x4   :  { %115 = dma.done.wait [#allocation3], 256  }
   0x5   :  { %116 = vsyncadd [#allocation3], 4294967040  ;;  %v120_v0 = vmov 0   ;;  %v28_v1 = vld [vmem:[%s148_s1] sm:$0xff]  ;;  %v121_v2 = vmov 1   ;;  %v27_v5 = vld [vmem:[#allocation2 + $0x8] sm:$0xff] }
   0x6   :  { %65 = vset.pattern.permute.xlu0 %v120_v0  ;;  %v26_v4 = vld [vmem:[#allocation2] sm:$0xff]  ;;  %s122_s0 = smov [#allocation5]   ;;  %s51_s19 = sshll.u32 %s149_s2, 4  ;;  %s52_s19 = int_to_ptr.hbm [resolvable:$true] %s51_s19 }
   0x7   :  { %31 = vperm.xlu0 %65, %v28_v1   ;;  %s49_s16 = sshll.u32 %s122_s0, 4  ;;  %s50_s16 = int_to_ptr.vmem [resolvable:$true] %s49_s16 }
   0xf   :  { %66 = vset.pattern.permute.xlu0 %v121_v2 }
  0x10   :  { %37 = vperm.xlu0 %66, %v28_v1  }
  0x79   :  { %v32_v3 = vpop.permute.xlu0 %31 }
  0x7a   :  { %v34_v6 = vmul.f32 %v32_v3, %v26_v4  ;;  %v35_v7 = vmul.f32 %v32_v3, %v27_v5 }
  0x82   :  { %v38_v8 = vpop.permute.xlu0 %37 }
  0x83   :  { %v40_v9 = vadd.f32 %v38_v8, %v34_v6  ;;  %v41_v10 = vadd.f32 %v38_v8, %v35_v7 }
  0x85   :  { %42 = vst [vmem:[#allocation5] sm:$0xff] %v40_v9 }
  0x86   :  { %43 = vst [vmem:[#allocation5 + $0x8] sm:$0xff] %v41_v10 }
  0x87   :  { %54 = dma.vmem_to_hbm [thread:$0]  %s50_s16, 256, %s52_s19, [#allocation4]  }
  0x88   :  { %117 = dma.done.wait [#allocation4], 256  }
  0x89   :  { %118 = vsyncadd [#allocation4], 4294967040 }
  0x8a   :  { %59 = vsyncpa [#allocation3], 1 }
  0x8b   :  { %60 = vsyncpa [#allocation4], 1 }

</bundles_post_ra>
